<compile_context>
chip_gen: v7x
topology: tpu7x:2x2x1
jax: 0.10.0
libtpu: 0.0.40
codegen_flags: <defaults>
</compile_context>

<pallas_src>
import functools

import jax
import jax.numpy as jnp
from jax.experimental import pallas as pl
from jax.experimental.pallas import tpu as pltpu


def _round_up(x, m):
    return ((x + m - 1) // m) * m


# ----------------------------------------------------------------------------
# Kernel: one batch tile of the fused (predictor || target) 3-layer MLP.
# ----------------------------------------------------------------------------
def rnd_fused_kernel(obs_ref, w1_ref, w2_ref, w3_ref, b_ref,
                     pred_ref, targ_ref, *, hf1, hf2, out_dim):
    x = obs_ref[...]                                        # (tb, obs_dim) bf16
    b1 = b_ref[:, pl.ds(0, hf1)]                            # (1, hf1)  f32
    b2 = b_ref[:, pl.ds(hf1, hf2)]                          # (1, hf2)  f32
    b3 = b_ref[:, pl.ds(hf1 + hf2, 2 * out_dim)]            # (1, 2*out_dim) f32

    # bf16 MXU matmuls, f32 accumulation; bias-add / ReLU in f32 on the VPU.
    h = jnp.dot(x, w1_ref[...], preferred_element_type=jnp.float32) + b1
    h = jnp.maximum(h, 0.0).astype(jnp.bfloat16)
    h = jnp.dot(h, w2_ref[...], preferred_element_type=jnp.float32) + b2
    h = jnp.maximum(h, 0.0).astype(jnp.bfloat16)
    y = jnp.dot(h, w3_ref[...], preferred_element_type=jnp.float32) + b3

    # Predictor features in cols [0, out_dim), target in [out_dim, 2*out_dim).
    pred_ref[...] = y[:, :out_dim].astype(pred_ref.dtype)
    targ_ref[...] = y[:, out_dim:2 * out_dim].astype(targ_ref.dtype)


# ----------------------------------------------------------------------------
# One-time parameter packing: fuse predictor + target into lane-dense slabs.
# ----------------------------------------------------------------------------
def pack_rnd_params(predictor_params, target_params):
    pw1, pb1, pw2, pb2, pw3, pb3 = predictor_params
    tw1, tb1, tw2, tb2, tw3, tb3 = target_params
    obs_dim, h1 = pw1.shape
    h2 = pw2.shape[1]
    out_dim = pw3.shape[1]

    hf1 = _round_up(2 * h1, 128)        # fused hidden-1 width (lane-dense)
    hf2 = _round_up(2 * h2, 128)        # fused hidden-2 width
    outc = 2 * out_dim                  # compact fused output width (no zero pad)
    f32, bf16 = jnp.float32, jnp.bfloat16

    # Layer 1: concat columns (pred then target), zero-pad to hf1 lanes.
    w1f = jnp.zeros((obs_dim, hf1), f32)
    w1f = w1f.at[:, :h1].set(pw1).at[:, h1:2 * h1].set(tw1)

    # Layer 2: block-diagonal so pred/target streams stay independent.
    w2f = jnp.zeros((hf1, hf2), f32)
    w2f = w2f.at[:h1, :h2].set(pw2).at[h1:2 * h1, h2:2 * h2].set(tw2)

    # Layer 3: block-diagonal, compact (pred cols then target cols).
    w3f = jnp.zeros((hf2, outc), f32)
    w3f = w3f.at[:h2, :out_dim].set(pw3).at[h2:2 * h2, out_dim:outc].set(tw3)

    # All biases in one f32 row: [b1_fused | b2_fused | b3_fused].
    bias = jnp.zeros((1, hf1 + hf2 + outc), f32)
    bias = bias.at[:, :h1].set(pb1.reshape(1, -1))
    bias = bias.at[:, h1:2 * h1].set(tb1.reshape(1, -1))
    bias = bias.at[:, hf1:hf1 + h2].set(pb2.reshape(1, -1))
    bias = bias.at[:, hf1 + h2:hf1 + 2 * h2].set(tb2.reshape(1, -1))
    bias = bias.at[:, hf1 + hf2:hf1 + hf2 + out_dim].set(pb3.reshape(1, -1))
    bias = bias.at[:, hf1 + hf2 + out_dim:hf1 + hf2 + outc].set(tb3.reshape(1, -1))

    packed = (w1f.astype(bf16), w2f.astype(bf16), w3f.astype(bf16), bias)
    dims = dict(obs_dim=obs_dim, h1=h1, h2=h2, out_dim=out_dim,
                hf1=hf1, hf2=hf2, outc=outc)
    return packed, dims


# ----------------------------------------------------------------------------
# Forward wrapper: grid over batch, weights VMEM-resident each step.
# ----------------------------------------------------------------------------
def rnd_forward(obs, packed_params, dims, *, batch_tile=2048):
    w1f, w2f, w3f, bias = packed_params
    B, obs_dim = obs.shape
    hf1, hf2, out_dim = dims["hf1"], dims["hf2"], dims["out_dim"]

    # Large tiles amortize per-grid-step overhead; cap at ~B/2 (multiple of 8)
    # so the grid keeps >=2 steps for v7x's two TensorCores when B is large.
    half = _round_up(pl.cdiv(B, 2), 8)
    tb = max(8, min(batch_tile, half))
    grid = (pl.cdiv(B, tb),)

    kern = functools.partial(rnd_fused_kernel, hf1=hf1, hf2=hf2, out_dim=out_dim)

    obs_bf16 = obs.astype(jnp.bfloat16)

    pred, targ = pl.pallas_call(
        kern,
        out_shape=(jax.ShapeDtypeStruct((B, out_dim), jnp.float32),
                   jax.ShapeDtypeStruct((B, out_dim), jnp.float32)),
        grid=grid,
        in_specs=[
            pl.BlockSpec((tb, obs_dim), lambda i: (i, 0)),   # obs: batch-tiled
            pl.BlockSpec(w1f.shape, lambda i: (0, 0)),       # weights: whole array,
            pl.BlockSpec(w2f.shape, lambda i: (0, 0)),       # VMEM-resident each step
            pl.BlockSpec(w3f.shape, lambda i: (0, 0)),
            pl.BlockSpec(bias.shape, lambda i: (0, 0)),
        ],
        out_specs=(
            pl.BlockSpec((tb, out_dim), lambda i: (i, 0)),   # predictor features
            pl.BlockSpec((tb, out_dim), lambda i: (i, 0)),   # target features
        ),
        compiler_params=pltpu.CompilerParams(
            dimension_semantics=("parallel",),   # shard batch tiles across TCs
        ),
    )(obs_bf16, w1f, w2f, w3f, bias)

    return pred, targ


# ----------------------------------------------------------------------------
# Raw (unfused) MLP param init — mirrors MLPModule defaults (ReLU hidden,
# identity output).
# ----------------------------------------------------------------------------
def init_mlp_params(key, obs_dim, hidden_sizes, output_dim):
    dims = [obs_dim] + list(hidden_sizes) + [output_dim]
    params = []
    for i in range(len(dims) - 1):
        key, wk = jax.random.split(key)
        fan_in, fan_out = dims[i], dims[i + 1]
        scale = jnp.sqrt(2.0 / (fan_in + fan_out))
        w = (scale * jax.random.normal(wk, (fan_in, fan_out))).astype(jnp.float32)
        b = jnp.zeros((1, fan_out), dtype=jnp.float32)
        params += [w, b]
    return tuple(params)


if __name__ == "__main__":
    # NOTE: the frozen-target / requires_grad=False aspect is a training-time
    # property; the forward pass below is identical for both networks.
    obs_dim, output_dim = 32, 16
    hidden_sizes = (64, 64)
    batch = 8

    key = jax.random.PRNGKey(0)
    k_obs, k_pred, k_targ = jax.random.split(key, 3)

    obs = jax.random.normal(k_obs, (batch, obs_dim), dtype=jnp.float32)
    predictor_params = init_mlp_params(k_pred, obs_dim, hidden_sizes, output_dim)
    target_params = init_mlp_params(k_targ, obs_dim, hidden_sizes, output_dim)

    packed, dims = pack_rnd_params(predictor_params, target_params)
    pred_feat, targ_feat = rnd_forward(obs, packed, dims)
    jax.block_until_ready((pred_feat, targ_feat))

    # Sanity check against plain-JAX f32 reference (unfused MLPs). Tolerance is
    # loosened because the kernel uses bf16 matmul inputs (f32 accumulation).
    def ref_mlp(x, p):
        w1, b1, w2, b2, w3, b3 = p
        h = jnp.maximum(x @ w1 + b1, 0.0)
        h = jnp.maximum(h @ w2 + b2, 0.0)
        return h @ w3 + b3

    assert pred_feat.shape == (batch, output_dim)
    assert targ_feat.shape == (batch, output_dim)
    assert jnp.allclose(pred_feat, ref_mlp(obs, predictor_params),
                        atol=5e-2, rtol=5e-2)
    assert jnp.allclose(targ_feat, ref_mlp(obs, target_params),
                        atol=5e-2, rtol=5e-2)

    print("KERNEL_OK")
</pallas_src>

<mosaic_0001>
module attributes {stable_mosaic.version = 11 : i64} {
  func.func @rnd_fused_kernel(%arg0: i32, %arg1: memref<8x32xbf16, #tpu.memory_space<vmem>>, %arg2: memref<32x128xbf16, #tpu.memory_space<vmem>>, %arg3: memref<128x128xbf16, #tpu.memory_space<vmem>>, %arg4: memref<128x32xbf16, #tpu.memory_space<vmem>>, %arg5: memref<1x288xf32, #tpu.memory_space<vmem>>, %arg6: memref<8x16xf32, #tpu.memory_space<vmem>>, %arg7: memref<8x16xf32, #tpu.memory_space<vmem>>) attributes {dimension_semantics = [#tpu.dimension_semantics<parallel>], iteration_bounds = array<i64: 1>, scalar_prefetch = 0 : i64, scratch_operands = 0 : i64, tpu.core_type = #tpu.core_type<tc>, window_params = [{transform_indices = @transform_0, window_bounds = array<i64: 8, 32>}, {pipeline_mode = #tpu.pipeline_mode<synchronous>, transform_indices = @transform_1, window_bounds = array<i64: 32, 128>}, {pipeline_mode = #tpu.pipeline_mode<synchronous>, transform_indices = @transform_2, window_bounds = array<i64: 128, 128>}, {pipeline_mode = #tpu.pipeline_mode<synchronous>, transform_indices = @transform_3, window_bounds = array<i64: 128, 32>}, {pipeline_mode = #tpu.pipeline_mode<synchronous>, transform_indices = @transform_4, window_bounds = array<i64: 1, 288>}, {transform_indices = @transform_5, window_bounds = array<i64: 8, 16>}, {transform_indices = @transform_6, window_bounds = array<i64: 8, 16>}]} {
    %c0 = arith.constant 0 : index
    %c0_0 = arith.constant 0 : index
    %0 = vector.load %arg1[%c0, %c0_0] : memref<8x32xbf16, #tpu.memory_space<vmem>>, vector<8x32xbf16>
    %c0_1 = arith.constant 0 : index
    %c0_2 = arith.constant 0 : index
    %1 = vector.load %arg5[%c0_1, %c0_2] : memref<1x288xf32, #tpu.memory_space<vmem>>, vector<1x128xf32>
    %c0_3 = arith.constant 0 : index
    %c128 = arith.constant 128 : index
    %2 = vector.load %arg5[%c0_3, %c128] : memref<1x288xf32, #tpu.memory_space<vmem>>, vector<1x128xf32>
    %c0_4 = arith.constant 0 : index
    %c256 = arith.constant 256 : index
    %3 = vector.load %arg5[%c0_4, %c256] : memref<1x288xf32, #tpu.memory_space<vmem>>, vector<1x32xf32>
    %c0_5 = arith.constant 0 : index
    %c0_6 = arith.constant 0 : index
    %4 = vector.load %arg2[%c0_5, %c0_6] : memref<32x128xbf16, #tpu.memory_space<vmem>>, vector<32x128xbf16>
    %cst = arith.constant dense<0.000000e+00> : vector<8x128xf32>
    %5 = tpu.matmul %0, %4, %cst {dimension_numbers = #tpu.dot_dimension_numbers<[1], [0], [0], [1], [0, 0, 1, 1], [], []>} : vector<8x32xbf16>, vector<32x128xbf16>, vector<8x128xf32> -> vector<8x128xf32>
    %6 = vector.broadcast %1 : vector<1x128xf32> to vector<8x128xf32>
    %7 = arith.addf %5, %6 : vector<8x128xf32>
    %cst_7 = arith.constant 0.000000e+00 : f32
    %8 = vector.broadcast %cst_7 : f32 to vector<8x128xf32>
    %9 = arith.maximumf %7, %8 : vector<8x128xf32>
    %10 = arith.truncf %9 : vector<8x128xf32> to vector<8x128xbf16>
    %c0_8 = arith.constant 0 : index
    %c0_9 = arith.constant 0 : index
    %11 = vector.load %arg3[%c0_8, %c0_9] : memref<128x128xbf16, #tpu.memory_space<vmem>>, vector<128x128xbf16>
    %cst_10 = arith.constant dense<0.000000e+00> : vector<8x128xf32>
    %12 = tpu.matmul %10, %11, %cst_10 {dimension_numbers = #tpu.dot_dimension_numbers<[1], [0], [0], [1], [0, 0, 1, 1], [], []>} : vector<8x128xbf16>, vector<128x128xbf16>, vector<8x128xf32> -> vector<8x128xf32>
    %13 = vector.broadcast %2 : vector<1x128xf32> to vector<8x128xf32>
    %14 = arith.addf %12, %13 : vector<8x128xf32>
    %cst_11 = arith.constant 0.000000e+00 : f32
    %15 = vector.broadcast %cst_11 : f32 to vector<8x128xf32>
    %16 = arith.maximumf %14, %15 : vector<8x128xf32>
    %17 = arith.truncf %16 : vector<8x128xf32> to vector<8x128xbf16>
    %c0_12 = arith.constant 0 : index
    %c0_13 = arith.constant 0 : index
    %18 = vector.load %arg4[%c0_12, %c0_13] : memref<128x32xbf16, #tpu.memory_space<vmem>>, vector<128x32xbf16>
    %cst_14 = arith.constant dense<0.000000e+00> : vector<8x32xf32>
    %19 = tpu.matmul %17, %18, %cst_14 {dimension_numbers = #tpu.dot_dimension_numbers<[1], [0], [0], [1], [0, 0, 1, 1], [], []>} : vector<8x128xbf16>, vector<128x32xbf16>, vector<8x32xf32> -> vector<8x32xf32>
    %20 = vector.broadcast %3 : vector<1x32xf32> to vector<8x32xf32>
    %21 = arith.addf %19, %20 : vector<8x32xf32>
    %22 = vector.extract_strided_slice %21 {offsets = [0, 0], sizes = [8, 16], strides = [1, 1]} : vector<8x32xf32> to vector<8x16xf32>
    %c0_15 = arith.constant 0 : index
    %c0_16 = arith.constant 0 : index
    %23 = vector.load %arg6[%c0_15, %c0_16] : memref<8x16xf32, #tpu.memory_space<vmem>>, vector<8x16xf32>
    tpu.vector_store %arg6[%c0_15, %c0_16], %22 {strides = array<i32>} : memref<8x16xf32, #tpu.memory_space<vmem>>, vector<8x16xf32>,
    %24 = vector.extract_strided_slice %21 {offsets = [0, 16], sizes = [8, 16], strides = [1, 1]} : vector<8x32xf32> to vector<8x16xf32>
    %c0_17 = arith.constant 0 : index
    %c0_18 = arith.constant 0 : index
    %25 = vector.load %arg7[%c0_17, %c0_18] : memref<8x16xf32, #tpu.memory_space<vmem>>, vector<8x16xf32>
    tpu.vector_store %arg7[%c0_17, %c0_18], %24 {strides = array<i32>} : memref<8x16xf32, #tpu.memory_space<vmem>>, vector<8x16xf32>,
    return
  }
  func.func @transform_0(%arg0: i32) -> (i32, i32) {
    %c0_i32 = arith.constant 0 : i32
    %c0_i32_0 = arith.constant 0 : i32
    return %arg0, %c0_i32 : i32, i32
  }
  func.func @transform_1(%arg0: i32) -> (i32, i32) {
    %c0_i32 = arith.constant 0 : i32
    %c0_i32_0 = arith.constant 0 : i32
    %c0_i32_1 = arith.constant 0 : i32
    return %c0_i32, %c0_i32_0 : i32, i32
  }
  func.func @transform_2(%arg0: i32) -> (i32, i32) {
    %c0_i32 = arith.constant 0 : i32
    %c0_i32_0 = arith.constant 0 : i32
    %c0_i32_1 = arith.constant 0 : i32
    return %c0_i32, %c0_i32_0 : i32, i32
  }
  func.func @transform_3(%arg0: i32) -> (i32, i32) {
    %c0_i32 = arith.constant 0 : i32
    %c0_i32_0 = arith.constant 0 : i32
    %c0_i32_1 = arith.constant 0 : i32
    return %c0_i32, %c0_i32_0 : i32, i32
  }
  func.func @transform_4(%arg0: i32) -> (i32, i32) {
    %c0_i32 = arith.constant 0 : i32
    %c0_i32_0 = arith.constant 0 : i32
    %c0_i32_1 = arith.constant 0 : i32
    return %c0_i32, %c0_i32_0 : i32, i32
  }
  func.func @transform_5(%arg0: i32) -> (i32, i32) {
    %c0_i32 = arith.constant 0 : i32
    %c0_i32_0 = arith.constant 0 : i32
    return %arg0, %c0_i32 : i32, i32
  }
  func.func @transform_6(%arg0: i32) -> (i32, i32) {
    %c0_i32 = arith.constant 0 : i32
    %c0_i32_0 = arith.constant 0 : i32
    return %arg0, %c0_i32 : i32, i32
  }
}

</mosaic_0001>

<bundles_post_ra>
// kernel: tpu_custom_call.1
= control target key start
LH: loop header
LB: loop body
LE: loop exit
PB: predicated region body
PF: predicated region fallthrough
CT: control target
= control target key end

     0   :  { %12 = vsyncpa [#allocation3], 0  ;;  %v516_v1 = vmov 0.0   ;;  %vm517_vm0 = vmmov 0   ;;  %vm51_vm1 = vcmask 261120   ;;  %s672_s0 = inlined_call_operand.vmem [shape: bf16[8,32], index: 0, kind: input, shape index: {}]   ;;  %s673_s1 = inlined_call_operand.vmem [shape: bf16[32,128], index: 1, kind: input, shape index: {}]   ;;  %s674_s2 = inlined_call_operand.vmem [shape: bf16[128,128], index: 2, kind: input, shape index: {}]   ;;  %s675_s3 = inlined_call_operand.vmem [shape: bf16[128,32], index: 3, kind: input, shape index: {}]   ;;  %s676_s4 = inlined_call_operand.vmem [shape: f32[1,288], index: 4, kind: input, shape index: {}]   ;;  %s677_s5 = inlined_call_operand.hbm [shape: f32[8,16], index: 5, kind: output, shape index: {0}]   ;;  %s678_s6 = inlined_call_operand.hbm [shape: f32[8,16], index: 6, kind: output, shape index: {1}]  }
   0x1   :  { %v450_v0 = vld [vmem:[%s673_s1] sm:$0xff]   ;;  %397 = vmatprep.subr.bf16.mxu0 %v516_v1  ;;  %405 = vmatprep.subr.bf16.mxu1 %v516_v1  ;;  %v451_v2 = vld [vmem:[%s673_s1 + $0x8] sm:$0xff]   ;;  %v454_v6 = vld [vmem:[%s674_s2 + $0x10] sm:$0xff]  }
   0x2   :  { %398 = vmatpush3.bf16.msra.mxu0 %v450_v0  ;;  %401 = vmatprep.mubr.msk.bf16.mxu0 %vm517_vm0, %v516_v1  ;;  %v452_v3 = vld [vmem:[%s674_s2] sm:$0xff]   ;;  %v453_v4 = vld [vmem:[%s674_s2 + $0x8] sm:$0xff]   ;;  %v455_v7 = vld [vmem:[%s674_s2 + $0x18] sm:$0xff]  }
   0x3   :  { %399 = vmatprep.subr.bf16.mxu0 %v516_v1  ;;  %421 = vmatprep.mubr.msk.bf16.mxu1 %vm517_vm0, %v516_v1  ;;  %v25_v5 = vld [vmem:[%s672_s0] sm:$0xf] }
   0x4   :  { %406 = vmatpush3.bf16.msra.mxu1 %v452_v3 }
   0x5   :  { %407 = vmatprep.subr.bf16.mxu1 %v516_v1 }
   0x6   :  { %400 = vmatpush3.bf16.msra.mxu0 %v451_v2 }
   0x7   :  { %425 = vmatprep.subr.bf16.mxu0 %v516_v1 }
   0x8   :  { %408 = vmatpush3.bf16.msra.mxu1 %v453_v4 }
   0x9   :  { %402 = vmatmul.mubr.msk.bf16.vlgmr.msra.gmra.mrb[0].mxu0 %vm51_vm1, %v25_v5  ;;  %409 = vmatprep.subr.bf16.mxu1 %v516_v1 }
   0xa   :  { %441 = vmatprep.mubr.msk.bf16.mxu0 %vm517_vm0, %v516_v1 }
   0xc   :  { %410 = vmatpush3.bf16.msra.mxu1 %v454_v6 }
   0xd   :  { %411 = vmatprep.subr.bf16.mxu1 %v516_v1 }
   0xe   :  { %13 = vsyncpa [#allocation5], 0  ;;  %v456_v8 = vld [vmem:[%s674_s2 + $0x20] sm:$0xff]   ;;  %v457_v9 = vld [vmem:[%s674_s2 + $0x28] sm:$0xff]   ;;  %s518_s12 = smov [#allocation2]   ;;  %vm319_vm2 = vcmask 130048  }
   0xf   :  { %v458_v10 = vld [vmem:[%s674_s2 + $0x30] sm:$0xff]   ;;  %v459_v11 = vld [vmem:[%s674_s2 + $0x38] sm:$0xff]   ;;  %v460_v12 = vld [vmem:[%s675_s3] sm:$0xff]   ;;  %s332_s13 = sshll.u32 %s518_s12, 4  ;;  %s333_s13 = int_to_ptr.vmem [resolvable:$true] %s332_s13 }
  0x10   :  { %412 = vmatpush3.bf16.msra.mxu1 %v455_v7  ;;  %426 = vmatpush3.bf16.msra.mxu0 %v460_v12  ;;  %v461_v13 = vld [vmem:[%s675_s3 + $0x8] sm:$0xff]   ;;  %v462_v14 = vld [vmem:[%s675_s3 + $0x10] sm:$0xff]   ;;  %v463_v15 = vld [vmem:[%s675_s3 + $0x18] sm:$0xff]   ;;  %s468_s14 = scalar_lea.vmem %s333_s13, 128  ;;  %p473_p1 = scmp.lt.s32.totalorder %s333_s13, %s333_s13 }
  0x11   :  { %413 = vmatprep.subr.bf16.mxu1 %v516_v1  ;;  %427 = vmatprep.subr.bf16.mxu0 %v516_v1  ;;  %v464_v16 = vld [vmem:[%s675_s3 + $0x20] sm:$0xff]   ;;  %v465_v17 = vld [vmem:[%s675_s3 + $0x28] sm:$0xff]   ;;  %v466_v26 = vld [vmem:[%s675_s3 + $0x30] sm:$0xff]   ;;  %p469_p0 = scmp.ne.s32.totalorder %s333_s13, %s468_s14  ;;  %p474_p2 = scmp.lt.s32.totalorder %s468_s14, %s468_s14 }
  0x12   :  { %v354_v18 = vld [vmem:[%s676_s4] ss:$0 sm:$0xff]  ;;  %v467_v27 = vld [vmem:[%s675_s3 + $0x38] sm:$0xff]   ;;  %v358_v28 = vld [vmem:[%s676_s4 + $0x1] ss:$0 sm:$0xff]  ;;  %s519_s3 = smov 112  }
  0x13   :  { %v367_v36 = vld [vmem:[%s676_s4 + $0x2] ss:$0 sm:$0xff]  ;;  %p475_p3 = por %p474_p2, %p473_p1 }
  0x14   :  { %414 = vmatpush3.bf16.msra.mxu1 %v456_v8  ;;  %428 = vmatpush3.bf16.msra.mxu0 %v461_v13 }
  0x15   :  { %415 = vmatprep.subr.bf16.mxu1 %v516_v1  ;;  %429 = vmatprep.subr.bf16.mxu0 %v516_v1  ;;  %p476_p4 = pnand %p475_p3, %p469_p0 }
  0x18   :  { %416 = vmatpush3.bf16.msra.mxu1 %v457_v9  ;;  %430 = vmatpush3.bf16.msra.mxu0 %v462_v14 }
  0x19   :  { %417 = vmatprep.subr.bf16.mxu1 %v516_v1  ;;  %431 = vmatprep.subr.bf16.mxu0 %v516_v1 }
  0x1c   :  { %418 = vmatpush3.bf16.msra.mxu1 %v458_v10  ;;  %432 = vmatpush3.bf16.msra.mxu0 %v463_v15 }
  0x1d   :  { %419 = vmatprep.subr.bf16.mxu1 %v516_v1  ;;  %433 = vmatprep.subr.bf16.mxu0 %v516_v1 }
  0x20   :  { %420 = vmatpush3.bf16.msra.mxu1 %v459_v11  ;;  %434 = vmatpush3.bf16.msra.mxu0 %v464_v16 }
  0x21   :  { %435 = vmatprep.subr.bf16.mxu0 %v516_v1 }
  0x24   :  { %436 = vmatpush3.bf16.msra.mxu0 %v465_v17 }
  0x25   :  { %437 = vmatprep.subr.bf16.mxu0 %v516_v1 }
  0x28   :  { %438 = vmatpush3.bf16.msra.mxu0 %v466_v26 }
  0x29   :  { %439 = vmatprep.subr.bf16.mxu0 %v516_v1 }
  0x2c   :  { %440 = vmatpush3.bf16.msra.mxu0 %v467_v27 }
  0xdc   :  { %v89_v19 = vpop.f32.mrb[0].mxu0 }
  0xdd   :  { %v90_v20 = vadd.f32 %v354_v18, %v89_v19  ;;  %v403_v21 = vpop.f32.mrb[1].mxu0 }
  0xde   :  { %v92_v22 = vpop.f32.mrb[2].mxu0 }
  0xdf   :  { %v95_v23 = vmax.f32 %v90_v20, 0.0  ;;  %v404_v24 = vpop.f32.mrb[3].mxu0 }
  0xe1   :  { %v96_v25 = vpack.c.bf16 %v95_v23, %v95_v23 }
  0xe3   :  { %422 = vmatmul.mubr.bf16.vlgmr.msra.gmra.mrb[0].mxu1 %v96_v25 }
 0x1b6   :  { %v201_v29 = vpop.f32.mrb[0].mxu1 }
 0x1b7   :  { %v202_v30 = vadd.f32 %v358_v28, %v201_v29  ;;  %v423_v31 = vpop.f32.mrb[1].mxu1 }
 0x1b8   :  { %v204_v32 = vpop.f32.mrb[2].mxu1 }
 0x1b9   :  { %v207_v33 = vmax.f32 %v202_v30, 0.0  ;;  %v424_v34 = vpop.f32.mrb[3].mxu1 }
 0x1bb   :  { %v208_v35 = vpack.c.bf16 %v207_v33, %v207_v33 }
 0x1bd   :  { %442 = vmatmul.mubr.bf16.vlgmr.msra.gmra.mrb[4].mxu0 %v208_v35 }
 0x290   :  { %v313_v37 = vpop.f32.mrb[4].mxu0 }
 0x291   :  { %v314_v38 = vadd.f32 %v367_v36, %v313_v37  ;;  %v443_v39 = vpop.f32.mrb[5].mxu0 }
 0x292   :  { %v316_v40 = vpop.f32.mrb[6].mxu0 }
 0x293   :  { %v444_v41 = vpop.f32.mrb[7].mxu0  ;;  %322 = vrot.lane.b32.xlu0 %v314_v38, %s519_s3  ;;  %320 = vst.msk [vmem:[#allocation2] sm:$0xff] %vm319_vm2, %v314_v38 }
 0x294   :  { %479 = shalt.err (!%p476_p4)
}
 0x295   :  { %s480_s16 = scalar_lea.hbm %s677_s5, 128 }
 0x296   :  { %p481_p5 = scmp.ne.s32.totalorder %s677_s5, %s480_s16  ;;  %p484_p6 = scmp.lt.u32.totalorder %s480_s16, %s677_s5 }
 0x298   :  { %p486_p7 = pnand %p484_p6, %p481_p5 }
 0x29a   :  { %489 = shalt.err (!%p486_p7)
}
 0x29b   :  { %335 = dma.vmem_to_hbm [thread:$0]  %s333_s13, 128, %s677_s5, [#allocation3]  }
 0x29c   :  { %s520_s2 = smov [#allocation4]  }
 0x29d   :  { %s342_s23 = sshll.u32 %s520_s2, 4  ;;  %s343_s23 = int_to_ptr.vmem [resolvable:$true] %s342_s23 }
 0x29e   :  { %s490_s24 = scalar_lea.vmem %s343_s23, 128  ;;  %p495_p9 = scmp.lt.s32.totalorder %s343_s23, %s343_s23 }
 0x29f   :  { %p491_p8 = scmp.ne.s32.totalorder %s343_s23, %s490_s24  ;;  %p496_p10 = scmp.lt.s32.totalorder %s490_s24, %s490_s24 }
 0x2a1   :  { %p497_p11 = por %p496_p10, %p495_p9 }
 0x2a3   :  { %p498_p12 = pnand %p497_p11, %p491_p8 }
 0x305   :  { %v323_v42 = vpop.permute.xlu0 %322 }
 0x306   :  { %325 = vst.msk [vmem:[#allocation4] sm:$0xff] %vm319_vm2, %v323_v42 }
 0x307   :  { %501 = shalt.err (!%p498_p12)
}
 0x308   :  { %s502_s27 = scalar_lea.hbm %s678_s6, 128 }
 0x309   :  { %p503_p13 = scmp.ne.s32.totalorder %s678_s6, %s502_s27  ;;  %p506_p0 = scmp.lt.u32.totalorder %s502_s27, %s678_s6 }
 0x30b   :  { %p508_p1 = pnand %p506_p0, %p503_p13 }
 0x30d   :  { %511 = shalt.err (!%p508_p1)
}
 0x30e   :  { %345 = dma.vmem_to_hbm [thread:$0]  %s343_s23, 128, %s678_s6, [#allocation5]  }
 0x30f   :  { %512 = dma.done.wait [#allocation3], 128  }
 0x310   :  { %513 = vsyncadd [#allocation3], 4294967168 }
 0x311   :  { %514 = dma.done.wait [#allocation5], 128  }
 0x312   :  { %515 = vsyncadd [#allocation5], 4294967168 }
 0x313   :  { %352 = vsyncpa [#allocation3], 1 }
 0x314   :  { %353 = vsyncpa [#allocation5], 1 }

</bundles_post_ra>
